<compile_context>
chip_gen: v6e
topology: v6e:2x2x1
jax: 0.10.0
libtpu: 0.0.40
codegen_flags: <defaults>
</compile_context>

<pallas_src>
import numpy as np
import jax
import jax.numpy as jnp
from jax.experimental import pallas as pl
from jax.experimental.pallas import tpu as pltpu


def _tpu_config():
    """Generation-aware defaults: (vmem_limit_bytes, num_splits, bf16_compute_ok)."""
    try:
        kind = jax.devices()[0].device_kind.lower()
    except Exception:
        kind = ""
    if "v7" in kind:
        return 40 * 2**20, 2, True        # 64 MiB physical VMEM, 2 TCs/chip
    if "v6" in kind:
        return 96 * 2**20, 1, True        # 128 MiB physical, 1 TC, bf16 VALUs
    if "v4" in kind or "v5p" in kind:
        return 96 * 2**20, 2, False       # megacore, no bf16 VALUs
    if "v5" in kind:                      # v5e / v5 lite: 1 TC, no bf16 VALUs
        return 96 * 2**20, 1, False
    return 48 * 2**20, 1, False           # unknown: conservative, f32 compute


def _choose_tile(C, hw, pred_itemsize, vmem_budget, tile_p=None):
    """Pick a lane tile: ~4 MiB (f32-equivalent) pred blocks, VMEM-fitted."""
    if tile_p is None:
        tile_p = (4 * 2**20) // (max(int(C), 1) * 4)
    tile_p = max(128, (int(tile_p) // 128) * 128)
    tile_p = min(tile_p, 262144)          # keep per-tile pixel count << 2^24

    def vmem_need(tp):
        # double-buffered pred/tgt windows + in-kernel temporaries
        # (int32 row iota, possible f32 upcast, compare/select intermediates,
        #  two bf16 one-hots) + output / partial.
        return C * tp * (2 * pred_itemsize + 20) + 2 * tp * 4 + 4 * C * C * 4

    while tile_p > 512 and vmem_need(tile_p) > int(0.85 * vmem_budget):
        tile_p = max(512, (tile_p // 2 // 128) * 128)
    if tile_p >= hw:
        tile_p = hw                       # single full-extent block (any hw)
    return tile_p


def _make_confusion_kernel(C, hw, steps, needs_mask, compute_dtype):
    def kernel(pred_ref, tgt_ref, out_ref):
        # pred_ref: (C, TP)  float (bf16 or f32) -- classes on sublanes, pixels on lanes
        # tgt_ref:  (1, TP)  int32
        # out_ref:  (C, C)   int32 resident partial confusion matrix (per split)
        split = pl.program_id(0)
        n = pl.program_id(1)
        step = pl.program_id(2)

        @pl.when(jnp.logical_and(n == 0, step == 0))
        def _init():
            out_ref[...] = jnp.zeros_like(out_ref)

        p = pred_ref[...].astype(compute_dtype)     # no-op when dtypes match
        t = tgt_ref[...]                            # (1, TP) int32
        TP = p.shape[1]

        row = jax.lax.broadcasted_iota(jnp.int32, (C, TP), 0)

        # argmax over classes, first-occurrence tie-break (matches torch/numpy)
        m = jnp.max(p, axis=0, keepdims=True)                             # (1, TP)
        idx = jnp.min(jnp.where(p == m, row, C), axis=0, keepdims=True)   # (1, TP)

        if needs_mask:
            # ragged tail / overshoot blocks: kill the target one-hot column.
            # (garbage pred values in the padded tail are then harmless)
            blk = split * steps + step
            lane = jax.lax.broadcasted_iota(jnp.int32, (1, TP), 1)
            t = jnp.where(blk * TP + lane < hw, t, C)

        pred_oh = (row == idx).astype(jnp.bfloat16)   # 0/1 exact in bf16
        tgt_oh = (row == t).astype(jnp.bfloat16)      # out-of-range -> zero column

        # conf[i, j] += sum_p pred_oh[i, p] * tgt_oh[j, p]  (A @ B^T on the MXU)
        partial = jax.lax.dot_general(
            pred_oh, tgt_oh, (((1,), (1,)), ((), ())),
            preferred_element_type=jnp.float32)

        # exact in f32 (tile pixel count < 2^24), folded into int32 each step
        out_ref[...] += partial.astype(jnp.int32)

    return kernel


def confusion_matrix_pallas(pred, target, C, *, tile_p=None, num_splits=None,
                            vmem_limit_bytes=None):
    """pred: (N, C, HW) float (bf16/f32), target: (N, HW) int -> (C, C) int32."""
    N, Cc, HW = pred.shape
    assert Cc == C, (Cc, C)
    assert target.shape == (N, HW), (target.shape, (N, HW))

    default_vmem, default_splits, bf16_ok = _tpu_config()
    if vmem_limit_bytes is None:
        vmem_limit_bytes = default_vmem
    if num_splits is None:
        num_splits = default_splits

    if pred.dtype not in (jnp.bfloat16, jnp.float32):
        pred = pred.astype(jnp.float32)
    # stream in native dtype; compute in bf16 only where the VPU has bf16 ALUs
    compute_dtype = jnp.float32
    if pred.dtype == jnp.bfloat16 and bf16_ok:
        compute_dtype = jnp.bfloat16

    tile_p = _choose_tile(C, HW, pred.dtype.itemsize, vmem_limit_bytes, tile_p)
    n_blocks = pl.cdiv(HW, tile_p)
    num_splits = max(1, min(int(num_splits), n_blocks))
    steps = pl.cdiv(n_blocks, num_splits)
    last_blk = n_blocks - 1
    needs_mask = (HW % tile_p != 0) or (steps * num_splits != n_blocks)

    def pix_map(split, n, step):
        blk = split * steps + step
        # clamp so overshoot blocks (masked in-kernel) never DMA out of bounds
        return (n, 0, jnp.minimum(blk, last_blk))

    kernel = _make_confusion_kernel(C, HW, steps, needs_mask, compute_dtype)

    tgt = target.reshape(N, 1, HW).astype(jnp.int32)

    partials = pl.pallas_call(
        kernel,
        out_shape=jax.ShapeDtypeStruct((num_splits, C, C), jnp.int32),
        grid_spec=pltpu.PrefetchScalarGridSpec(
            num_scalar_prefetch=0,
            grid=(num_splits, N, steps),
            in_specs=[
                pl.BlockSpec((None, C, tile_p), pix_map),   # pred (class-major, lane-dense)
                pl.BlockSpec((None, 1, tile_p), pix_map),   # target (lane-dense)
            ],
            out_specs=pl.BlockSpec((None, C, C), lambda s, n, j: (s, 0, 0)),
        ),
        compiler_params=pltpu.CompilerParams(
            dimension_semantics=("parallel", "arbitrary", "arbitrary"),
            vmem_limit_bytes=int(vmem_limit_bytes)),
    )(pred, tgt)

    return partials.sum(axis=0)


class MIoU:
    """JAX/Pallas port of the PyTorch mIoU metric module."""

    def __init__(self, C, tile_p=None, num_splits=None):
        self.C = C
        self.tile_p = tile_p
        self.num_splits = num_splits
        self.reset()

    def reset(self):
        # device-resident accumulator; pulled to host only in iou()/get()
        self.matrix = jnp.zeros((self.C, self.C), dtype=jnp.int32)

    def forward(self, pred, target):
        # pred: (N, C, H, W) float (NCHW, as in PyTorch); target: (N, H, W) int
        pred = jnp.asarray(pred)
        target = jnp.asarray(target)
        if pred.dtype not in (jnp.bfloat16, jnp.float32):
            pred = pred.astype(jnp.float32)
        if pred.shape[-2:] != tuple(target.shape[-2:]):
            # Upsample = F.interpolate(mode='bilinear', align_corners=False).
            # Done in bf16 so the materialized full-res logits are half-size.
            # TODO(synk): fuse the 2x2-tap bilinear lerp into the Pallas kernel so
            # the upsampled logits are never written to HBM at all.
            N, Cc = pred.shape[:2]
            pred = jax.image.resize(
                pred.astype(jnp.bfloat16), (N, Cc) + tuple(target.shape[-2:]),
                method='bilinear')
        N, Cc, H, W = pred.shape
        assert Cc == self.C, (Cc, self.C)
        pred_flat = pred.reshape(N, Cc, H * W)      # free reshape, no transpose
        tgt_flat = target.reshape(N, H * W)
        mat = confusion_matrix_pallas(
            pred_flat, tgt_flat, self.C,
            tile_p=self.tile_p, num_splits=self.num_splits)
        self.matrix = self.matrix + mat             # stays on device
        return mat

    __call__ = forward

    def iou(self, c):
        m = np.asarray(self.matrix)
        I = m[c, c]
        U = m[c, :].sum() + m[:, c].sum() - I
        return I / (U + 1e-15)

    def get(self):
        ret = 0.0
        for i in range(self.C):
            ret += self.iou(i)
        return ret / self.C


def _reference_confusion(pred, target, C):
    lbl = np.asarray(jnp.argmax(jnp.asarray(pred, dtype=jnp.float32), axis=1)).reshape(-1)
    tgt = np.asarray(target).reshape(-1)
    mat = np.zeros((C, C), dtype=np.int32)
    for i, j in zip(lbl, tgt):
        if 0 <= i < C and 0 <= j < C:
            mat[i, j] += 1
    return mat


if __name__ == "__main__":
    key = jax.random.PRNGKey(0)
    k1, k2, k3, k4, k5, k6 = jax.random.split(key, 6)

    # --- main test: typical module usage (f32 logits, matching spatial size) ---
    N, C, H, W = 2, 4, 16, 16
    pred = jax.random.normal(k1, (N, C, H, W), dtype=jnp.float32)
    target = jax.random.randint(k2, (N, H, W), 0, C, dtype=jnp.int32)

    metric = MIoU(C)
    mat = metric.forward(pred, target)              # runs the Pallas kernel
    jax.block_until_ready(mat)
    ref = _reference_confusion(pred, target, C)
    assert np.array_equal(np.asarray(mat), ref), (np.asarray(mat), ref)
    assert int(np.asarray(metric.matrix).sum()) == N * H * W
    _ = metric.get()                                # exercise iou/get aggregation

    # --- ragged / multi-block / bf16 streaming / 2-way split + clamp/mask ---
    N2, H2, W2 = 2, 13, 13                          # HW = 169 (not a multiple of 128)
    pred2 = jax.random.normal(k3, (N2, C, H2, W2), dtype=jnp.float32).astype(jnp.bfloat16)
    target2 = jax.random.randint(k4, (N2, H2, W2), 0, C, dtype=jnp.int32)
    mat2 = confusion_matrix_pallas(
        pred2.reshape(N2, C, H2 * W2), target2.reshape(N2, H2 * W2), C,
        tile_p=128, num_splits=2)
    mat2 = np.asarray(jax.block_until_ready(mat2))
    ref2 = _reference_confusion(pred2, target2, C)  # same bf16 values -> same argmax
    assert np.array_equal(mat2, ref2), (mat2, ref2)

    # --- bilinear-upsample branch (pred at half the target resolution) ---
    pred3 = jax.random.normal(k5, (1, C, 8, 8), dtype=jnp.float32)
    target3 = jax.random.randint(k6, (1, 16, 16), 0, C, dtype=jnp.int32)
    metric3 = MIoU(C)
    mat3 = np.asarray(jax.block_until_ready(metric3.forward(pred3, target3)))
    pred3_up = jax.image.resize(pred3.astype(jnp.bfloat16), (1, C, 16, 16),
                                method='bilinear')
    ref3 = _reference_confusion(pred3_up, target3, C)
    assert np.array_equal(mat3, ref3), (mat3, ref3)

    print("KERNEL_OK")
</pallas_src>

<mosaic_0001>
module attributes {stable_mosaic.version = 11 : i64} {
  func.func @kernel(%arg0: i32, %arg1: i32, %arg2: i32, %arg3: memref<1x4x256xf32, #tpu.memory_space<vmem>>, %arg4: memref<1x1x256xi32, #tpu.memory_space<vmem>>, %arg5: memref<1x4x4xi32, #tpu.memory_space<vmem>>) attributes {dimension_semantics = [#tpu.dimension_semantics<parallel>, #tpu.dimension_semantics<arbitrary>, #tpu.dimension_semantics<arbitrary>], iteration_bounds = array<i64: 1, 2, 1>, scalar_prefetch = 0 : i64, scratch_operands = 0 : i64, tpu.core_type = #tpu.core_type<tc>, window_params = [{transform_indices = @transform_0, window_bounds = array<i64: 1, 4, 256>}, {transform_indices = @transform_1, window_bounds = array<i64: 1, 1, 256>}, {transform_indices = @transform_2, window_bounds = array<i64: 1, 4, 4>}]} {
    %c0_i32 = arith.constant 0 : i32
    %0 = arith.cmpi eq, %arg1, %c0_i32 : i32
    %c0_i32_0 = arith.constant 0 : i32
    %1 = arith.cmpi eq, %arg2, %c0_i32_0 : i32
    %2 = arith.andi %0, %1 : i1
    %3 = arith.extui %2 : i1 to i32
    %c0_i32_1 = arith.constant 0 : i32
    %4 = arith.cmpi ne, %3, %c0_i32_1 : i32
    scf.if %4 {
      %c0_i32_15 = arith.constant 0 : i32
      %36 = vector.broadcast %c0_i32_15 : i32 to vector<4x4xi32>
      %c0_16 = arith.constant 0 : index
      %c0_17 = arith.constant 0 : index
      %c0_18 = arith.constant 0 : index
      %37 = vector.load %arg5[%c0_16, %c0_17, %c0_18] : memref<1x4x4xi32, #tpu.memory_space<vmem>>, vector<1x4x4xi32>
      %38 = vector.shape_cast %37 : vector<1x4x4xi32> to vector<4x4xi32>
      %39 = vector.shape_cast %36 : vector<4x4xi32> to vector<1x4x4xi32>
      tpu.vector_store %arg5[%c0_16, %c0_17, %c0_18], %39 {strides = array<i32>} : memref<1x4x4xi32, #tpu.memory_space<vmem>>, vector<1x4x4xi32>,
    } else {
    }
    %c0 = arith.constant 0 : index
    %c0_2 = arith.constant 0 : index
    %c0_3 = arith.constant 0 : index
    %5 = vector.load %arg3[%c0, %c0_2, %c0_3] : memref<1x4x256xf32, #tpu.memory_space<vmem>>, vector<1x4x256xf32>
    %6 = vector.shape_cast %5 : vector<1x4x256xf32> to vector<4x256xf32>
    %c0_4 = arith.constant 0 : index
    %c0_5 = arith.constant 0 : index
    %c0_6 = arith.constant 0 : index
    %7 = vector.load %arg4[%c0_4, %c0_5, %c0_6] : memref<1x1x256xi32, #tpu.memory_space<vmem>>, vector<1x1x256xi32>
    %8 = vector.shape_cast %7 : vector<1x1x256xi32> to vector<1x256xi32>
    %9 = tpu.iota {dimensions = array<i32: 0>} : vector<4x256xi32>
    %cst = arith.constant dense<0xFF800000> : vector<256xf32>
    %10 = vector.multi_reduction <maximumf>, %6, %cst [0] : vector<4x256xf32> to vector<256xf32>
    %11 = vector.shape_cast %10 : vector<256xf32> to vector<1x256xf32>
    %12 = vector.broadcast %11 : vector<1x256xf32> to vector<4x256xf32>
    %13 = arith.cmpf oeq, %6, %12 : vector<4x256xf32>
    %c4_i32 = arith.constant 4 : i32
    %14 = vector.broadcast %c4_i32 : i32 to vector<4x256xi32>
    %15 = arith.select %13, %9, %14 : vector<4x256xi1>, vector<4x256xi32>
    %cst_7 = arith.constant dense<2147483647> : vector<256xi32>
    %16 = vector.multi_reduction <minsi>, %15, %cst_7 [0] : vector<4x256xi32> to vector<256xi32>
    %17 = vector.shape_cast %16 : vector<256xi32> to vector<1x256xi32>
    %18 = vector.broadcast %17 : vector<1x256xi32> to vector<4x256xi32>
    %19 = arith.cmpi eq, %9, %18 : vector<4x256xi32>
    %20 = arith.extui %19 : vector<4x256xi1> to vector<4x256xi32>
    %21 = arith.sitofp %20 : vector<4x256xi32> to vector<4x256xf32>
    %22 = arith.truncf %21 : vector<4x256xf32> to vector<4x256xbf16>
    %23 = vector.broadcast %8 : vector<1x256xi32> to vector<4x256xi32>
    %24 = arith.cmpi eq, %9, %23 : vector<4x256xi32>
    %25 = arith.extui %24 : vector<4x256xi1> to vector<4x256xi32>
    %26 = arith.sitofp %25 : vector<4x256xi32> to vector<4x256xf32>
    %27 = arith.truncf %26 : vector<4x256xf32> to vector<4x256xbf16>
    %cst_8 = arith.constant dense<0.000000e+00> : vector<4x4xf32>
    %28 = tpu.matmul %22, %27, %cst_8 {dimension_numbers = #tpu.dot_dimension_numbers<[1], [1], [0], [0], [0, 0, 1, 0], [], []>} : vector<4x256xbf16>, vector<4x256xbf16>, vector<4x4xf32> -> vector<4x4xf32>
    %c0_9 = arith.constant 0 : index
    %c0_10 = arith.constant 0 : index
    %c0_11 = arith.constant 0 : index
    %29 = vector.load %arg5[%c0_9, %c0_10, %c0_11] : memref<1x4x4xi32, #tpu.memory_space<vmem>>, vector<1x4x4xi32>
    %30 = vector.shape_cast %29 : vector<1x4x4xi32> to vector<4x4xi32>
    %31 = arith.fptosi %28 : vector<4x4xf32> to vector<4x4xi32>
    %32 = arith.addi %30, %31 : vector<4x4xi32>
    %c0_12 = arith.constant 0 : index
    %c0_13 = arith.constant 0 : index
    %c0_14 = arith.constant 0 : index
    %33 = vector.load %arg5[%c0_12, %c0_13, %c0_14] : memref<1x4x4xi32, #tpu.memory_space<vmem>>, vector<1x4x4xi32>
    %34 = vector.shape_cast %33 : vector<1x4x4xi32> to vector<4x4xi32>
    %35 = vector.shape_cast %32 : vector<4x4xi32> to vector<1x4x4xi32>
    tpu.vector_store %arg5[%c0_12, %c0_13, %c0_14], %35 {strides = array<i32>} : memref<1x4x4xi32, #tpu.memory_space<vmem>>, vector<1x4x4xi32>,
    return
  }
  func.func @transform_0(%arg0: i32, %arg1: i32, %arg2: i32) -> (i32, i32, i32) {
    %c1_i32 = arith.constant 1 : i32
    %0 = arith.muli %arg0, %c1_i32 : i32
    %1 = arith.addi %0, %arg2 : i32
    %c0_i32 = arith.constant 0 : i32
    %2 = arith.minsi %1, %c0_i32 : i32
    %c0_i32_0 = arith.constant 0 : i32
    %c0_i32_1 = arith.constant 0 : i32
    return %arg1, %c0_i32_0, %2 : i32, i32, i32
  }
  func.func @transform_1(%arg0: i32, %arg1: i32, %arg2: i32) -> (i32, i32, i32) {
    %c1_i32 = arith.constant 1 : i32
    %0 = arith.muli %arg0, %c1_i32 : i32
    %1 = arith.addi %0, %arg2 : i32
    %c0_i32 = arith.constant 0 : i32
    %2 = arith.minsi %1, %c0_i32 : i32
    %c0_i32_0 = arith.constant 0 : i32
    %c0_i32_1 = arith.constant 0 : i32
    return %arg1, %c0_i32_0, %2 : i32, i32, i32
  }
  func.func @transform_2(%arg0: i32, %arg1: i32, %arg2: i32) -> (i32, i32, i32) {
    %c0_i32 = arith.constant 0 : i32
    %c0_i32_0 = arith.constant 0 : i32
    %c0_i32_1 = arith.constant 0 : i32
    return %arg0, %c0_i32, %c0_i32_0 : i32, i32, i32
  }
}

</mosaic_0001>

<bundles_post_ra>
// kernel: tpu_custom_call.1
= control target key start
LH: loop header
LB: loop body
LE: loop exit
PB: predicated region body
PF: predicated region fallthrough
CT: control target
= control target key end

     0   :  { %7 = vsyncpa [#allocation3], 0  ;;  %s893_s0 = inlined_call_operand.hbm [shape: f32[2,4,256], index: 0, kind: input, shape index: {}]   ;;  %s894_s1 = inlined_call_operand.hbm [shape: s32[2,1,256], index: 1, kind: input, shape index: {}]   ;;  %s895_s2 = inlined_call_operand.hbm [shape: s32[1,4,4], index: 2, kind: output, shape index: {}]  }
   0x1   :  { %9 = vsyncpa [#allocation3 + $0x1], 0 }
   0x2   :  { %10 = vsyncpa [#allocation6], 0 }
   0x3   :  { %12 = vsyncpa [#allocation6 + $0x1], 0 }
   0x4   :  { %13 = vsyncpa [#allocation4], 0  ;;  %s746_s9 = smov 0   ;;  %s748_s10 = smov 0  }
   0x5   :  { %s750_s11 = smov 0   ;;  %s752_s12 = smov 0  }
   0x6   :  { %s754_s13 = smov 0   ;;  %s756_s14 = smov 0  }
   0x7 LB: > { %s480_s15 = sadd.s32 4294967295, %s723_s14   ;;  %s34_s16 = sadd.s32 1, %s719_s13  ;;  %s723_s14 = sphi %s756_s14, %s19_s14   ;;  %s719_s13 = sphi %s754_s13, %s905_s13   ;;  %s715_s12 = sphi %s752_s12, %s904_s12   ;;  %s711_s11 = sphi %s750_s11, %s903_s11   ;;  %s707_s10 = sphi %s748_s10, %s902_s10   ;;  %s703_s9 = sphi %s746_s9, %s901_s9  }
   0x8   : > { %p36_p0 = scmp.ge.s32.totalorder %s34_s16, 2  ;;  %s53_s17 = sadd.s32 1, %s711_s11 }
   0x9   : > { %p60_p1 = scmp.ne.s32.totalorder %s711_s11, %s707_s10  ;;  %p61_p2 = scmp.eq.s32.totalorder %s723_s14, 0 }
   0xa   : > { %s907_s16 = smov (%p36_p0, %s34_s16), 0  ;;  %p66_p4 = scmp.ne.s32.totalorder %s707_s10, %s703_s9 }
   0xb   : > { %p782_p3 = por %p61_p2, %p60_p1  ;;  %s48_s19 = ssub.s32 %s719_s13, %s907_s16 }
   0xc   : > { %p67_p5 = scmp.eq.s32.totalorder %s480_s15, 0  ;;  %p51_p6 = scmp.eq.s32.totalorder %s48_s19, 0 }
   0xd   : > { %p529_p8 = scmp.lt.s32.totalorder %s723_s14, 2  ;;  %s800_s22 = sand.u32 1, %s711_s11  }
   0xe   : > { %p791_p7 = por %p67_p5, %p66_p4  ;;  %s509_s23 = sshll.u32 %s719_s13, 7 }
   0xf   : > { %s797_s21 = scalar_select %p51_p6, %s711_s11, %s53_s17  }
  0x10   : > { %s483_s24 = sshll.u32 %s800_s22, 3  ;;  %s165_s27 = scalar_lea.hbm %s893_s0, %s509_s23 }
  0x11   : > { %s154_s28 = scalar_lea.vmem [#allocation2], %s483_s24  ;;  %p809_p9 = pnand %p529_p8, %p782_p3 }
  0x12   : > { %s167_s29 = sshll.u32 %s154_s28, 4  ;;  %p489_p10 = scmp.ge.s32.totalorder %s723_s14, 1  ;;  %s168_s29 = int_to_ptr.vmem [resolvable:$true] %s167_s29 }
  0x13   : > { %p196_p11 = scmp.lt.s32.totalorder %s723_s14, 3  ;;  %s151_s3 = scalar_lea.sflag [#allocation3], %s800_s22 }
  0x14   : > { %p587_p12 = pneg %p809_p9  ;;  %s598_s4 = scalar_lea.vmem %s168_s29, 128 }
  0x15   : > { %p599_p13 = scmp.ne.s32.totalorder %s168_s29, %s598_s4  ;;  %s725_s5 = smov [#allocation2]  }
  0x16   : > { %s603_s6 = sshll.u32 %s725_s5, 4  ;;  %s604_s6 = int_to_ptr.vmem [resolvable:$false] %s603_s6 }
  0x17   : > { %p601_p0 = pnand %p599_p13, %p587_p12  ;;  %s605_s7 = scalar_lea.vmem %s604_s6, 256 }
  0x18   : > { %p606_p2 = scmp.lt.s32.totalorder %s168_s29, %s604_s6  ;;  %p607_p3 = scmp.lt.s32.totalorder %s605_s7, %s598_s4 }
  0x19   : > { %p602_p1 = pneg %p601_p0 }
  0x1a   : > { %p608_p4 = por %p607_p3, %p606_p2 }
  0x1c   : > { %p609_p5 = pnand %p608_p4, %p602_p1 }
  0x1e   : > { %612 = shalt.err (!%p609_p5)
}
  0x1f   : > { %525 = dma.hbm_to_vmem [thread:$0]  (!%p809_p9), %s165_s27, 128, %s168_s29, %s151_s3  }
  0x20   : > { %p827_p6 = pnand %p489_p10, %p196_p11  ;;  %s486_s9 = sshll.u32 %s800_s22, 1 }
  0x21   : > { %s510_s17 = sshll.u32 %s719_s13, 5  ;;  %s178_s24 = scalar_lea.vmem [#allocation5], %s486_s9 }
  0x22   : > { %s189_s23 = scalar_lea.hbm %s894_s1, %s510_s17  ;;  %s191_s25 = sshll.u32 %s178_s24, 4  ;;  %s192_s25 = int_to_ptr.vmem [resolvable:$true] %s191_s25 }
  0x23   : > { %s175_s26 = scalar_lea.sflag [#allocation6], %s800_s22  ;;  %s626_s28 = scalar_lea.vmem %s192_s25, 32 }
  0x24   : > { %p627_p8 = scmp.ne.s32.totalorder %s192_s25, %s626_s28  ;;  %s726_s27 = smov [#allocation5]  }
  0x25   : > { %s631_s29 = sshll.u32 %s726_s27, 4  ;;  %s632_s29 = int_to_ptr.vmem [resolvable:$false] %s631_s29 }
  0x26   : > { %p629_p13 = pnand %p627_p8, %p587_p12  ;;  %s633_s3 = scalar_lea.vmem %s632_s29, 64 }
  0x27   : > { %p634_p10 = scmp.lt.s32.totalorder %s192_s25, %s632_s29  ;;  %p635_p11 = scmp.lt.s32.totalorder %s633_s3, %s626_s28 }
  0x28   : > { %p630_p0 = pneg %p629_p13 }
  0x29   : > { %p636_p1 = por %p635_p11, %p634_p10 }
  0x2b   : > { %p637_p2 = pnand %p636_p1, %p630_p0 }
  0x2d   : > { %640 = shalt.err (!%p637_p2)
}
  0x2e   : > { %528 = dma.hbm_to_vmem [thread:$0]  (!%p809_p9), %s189_s23, 32, %s192_s25, %s175_s26  }
  0x2f   : > { %200 = sbr.rel (%p827_p6) target bundleno = 305 (0x131), region = 28  ;;  %s202_s22 = sand.u32 (!%p827_p6), 1, %s707_s10  }
  0x30   : > { %s490_s4 = sshll.u32 (!%p827_p6), %s202_s22, 3  ;;  %s203_s5 = scalar_lea.sflag (!%p827_p6), [#allocation3], %s202_s22 }
  0x31   : > { %s206_s6 = scalar_lea.vmem (!%p827_p6), [#allocation2], %s490_s4 }
  0x34   : > { %690 = dma.done.wait (%p791_p7), %s203_s5, 128  }
  0x35   : > { %692 = vsyncadd (%p791_p7), %s203_s5, 4294967168  ;;  %s491_s7 = sshll.u32 %s202_s22, 1  ;;  %s212_s9 = scalar_lea.sflag [#allocation6], %s202_s22 }
  0x36   : > { %s215_s17 = scalar_lea.vmem [#allocation5], %s491_s7 }
  0x37   : > { %694 = dma.done.wait (%p791_p7), %s212_s9, 32  }
  0x38   : > { %696 = vsyncadd (%p791_p7), %s212_s9, 4294967264  ;;  %p245_p9 = scmp.eq.s32.totalorder %s715_s12, 0 }
  0x39   : > { %vm251_vm0 = vcmask (%p245_p9), 27648   ;;  %v727_v0 = vmov (%p245_p9), 0  }
  0x3a   : > { %250 = sbr.rel (!%p245_p9) target bundleno = 63 (0x3f), region = 40  ;;  %252 = vst.msk [vmem:[#allocation7] sm:$0xf] (%p245_p9), %vm251_vm0, %v727_v0 }
  0x3f PF: > { %v255_v1 = vlaneseq  ;;  %v253_v2 = vld [vmem:[%s206_s6] sm:$0xff]  ;;  %vm260_vm1 = vcmask 1043456   ;;  %v254_v7 = vld [vmem:[%s215_s17] sm:$0x3]  ;;  %v728_v9 = vmov 839922192  }
  0x40   : > { %v258_v3 = vcombine.high %v253_v2, %v253_v2  ;;  %v261_v4 = vsel %vm260_vm1, %v253_v2, -inf  ;;  %v281_v10 = vunpack.c.l.s4 %v728_v9  ;;  %v729_v22 = vmov 1.0|1.0   ;;  %s730_s12 = smov [#allocation7]   ;;  %p860_p7 = scmp.eq.s32.totalorder %s480_s15, 1 }
  0x41   : > { %v256_v5 = vshrl.u32 %v255_v1, 7  ;;  %v262_v6 = vrot.slane %v261_v4, 4  ;;  %v373_v49 = vld [vmem:[#allocation7] sm:$0xf]  ;;  %s387_s20 = sshll.u32 %s730_s12, 4  ;;  %s388_s20 = int_to_ptr.vmem [resolvable:$true] %s387_s20 }
  0x42   : > { %v268_v8 = vsel %vm260_vm1, %v258_v3, -inf  ;;  %v282_v19 = vunpack.c.0.s8 %v281_v10  ;;  %s641_s8 = scalar_lea.vmem %s388_s20, 64  ;;  %p648_p5 = scmp.lt.s32.totalorder %s388_s20, %s388_s20 }
  0x43   : > { %v323_v11 = vsub.s32 1, %v256_v5  ;;  %v319_v12 = vsub.s32 0, %v256_v5  ;;  %v263_v13 = vmax.f32 %v261_v4, %v262_v6  ;;  %v269_v14 = vrot.slane %v268_v8, 4  ;;  %p642_p12 = scmp.ne.s32.totalorder %s388_s20, %s641_s8  ;;  %p649_p6 = scmp.lt.s32.totalorder %s641_s8, %s641_s8 }
  0x44   : > { %v285_v25 = vsub.s32 %v282_v19, %v256_v5 }
  0x45   : > { %v324_v15 = vrot.slane %v254_v7, %v323_v11  ;;  %v320_v16 = vrot.slane %v254_v7, %v319_v12  ;;  %v264_v17 = vrot.slane %v263_v13, 2  ;;  %v270_v18 = vmax.f32 %v268_v8, %v269_v14  ;;  %p643_p3 = pnand %p642_p12, %p860_p7  ;;  %p650_p8 = por %p649_p6, %p648_p5 }
  0x46   : > { %v286_v29 = vrot.slane %v256_v5, %v285_v25 }
  0x47   : > { %vm326_vm2 = vcmp.eq.s32.totalorder %v256_v5, %v324_v15  ;;  %vm325_vm3 = vcmp.eq.s32.totalorder %v256_v5, %v320_v16  ;;  %v265_v20 = vmax.f32 %v263_v13, %v264_v17  ;;  %v271_v21 = vrot.slane %v270_v18, 2  ;;  %p644_p4 = pneg %p643_p3 }
  0x48   : > { %vm497_vm4 = vmpackc.low %vm326_vm2, %vm326_vm2 }
  0x49   : > { %498 = vmatprep.subr.msk.bf16.mxu0 %vm497_vm4, %v729_v22  ;;  %vm499_vm5 = vmpackc.low %vm325_vm3, %vm325_vm3  ;;  %v266_v23 = vrot.slane %v265_v20, 1  ;;  %v272_v24 = vmax.f32 %v270_v18, %v271_v21  ;;  %p651_p13 = pnand %p650_p8, %p644_p4 }
  0x4a   : > { %500 = vmatpush1.bf16.xpose.msk.msra.mxu0 %vm499_vm5, %v729_v22 }
  0x4b   : > { %v267_v26 = vmax.f32 %v265_v20, %v266_v23  ;;  %v273_v27 = vrot.slane %v272_v24, 1 }
  0x4d   : > { %v274_v28 = vmax.f32 %v272_v24, %v273_v27 }
  0x4f   : > { %v277_v30 = vcombine.low %v267_v26, %v274_v28 }
  0x51   : > { %vm279_vm6 = vcmp.eq.f32.partialorder %v253_v2, %v277_v30 }
  0x52   : > { %v287_v31 = vsel %vm279_vm6, %v286_v29, 4 }
  0x53   : > { %v288_v32 = vcombine.high %v287_v31, %v287_v31  ;;  %v289_v33 = vsel %vm260_vm1, %v287_v31, 2147483647 }
  0x54   : > { %v290_v34 = vrot.slane %v289_v33, 4 }
  0x55   : > { %v299_v35 = vsel %vm260_vm1, %v288_v32, 2147483647  ;;  %vm376_vm1 = vcmask 27648  }
  0x56   : > { %v300_v36 = vrot.slane %v299_v35, 4  ;;  %vm291_vm7 = vcmp.lt.s32.totalorder %v289_v33, %v290_v34 }
  0x57   : > { %v292_v37 = vsel %vm291_vm7, %v289_v33, %v290_v34 }
  0x58   : > { %vm301_vm8 = vcmp.lt.s32.totalorder %v299_v35, %v300_v36  ;;  %v293_v38 = vrot.slane %v292_v37, 2 }
  0x59   : > { %v302_v39 = vsel %vm301_vm8, %v299_v35, %v300_v36 }
  0x5a   : > { %v303_v40 = vrot.slane %v302_v39, 2  ;;  %vm294_vm9 = vcmp.lt.s32.totalorder %v292_v37, %v293_v38 }
  0x5b   : > { %v295_v41 = vsel %vm294_vm9, %v292_v37, %v293_v38 }
  0x5c   : > { %vm304_vm10 = vcmp.lt.s32.totalorder %v302_v39, %v303_v40  ;;  %v296_v42 = vrot.slane %v295_v41, 1 }
  0x5d   : > { %v305_v43 = vsel %vm304_vm10, %v302_v39, %v303_v40 }
  0x5e   : > { %v306_v44 = vrot.slane %v305_v43, 1  ;;  %vm297_vm11 = vcmp.lt.s32.totalorder %v295_v41, %v296_v42 }
  0x5f   : > { %v298_v45 = vsel %vm297_vm11, %v295_v41, %v296_v42 }
  0x60   : > { %vm307_vm12 = vcmp.lt.s32.totalorder %v305_v43, %v306_v44  ;;  %vm309_vm13 = vcmp.eq.s32.totalorder %v256_v5, %v298_v45 }
  0x61   : > { %v308_v46 = vsel %vm307_vm12, %v305_v43, %v306_v44  ;;  %vm503_vm15 = vmpackc.low %vm309_vm13, %vm309_vm13 }
  0x62   : > { %vm310_vm14 = vcmp.eq.s32.totalorder %v256_v5, %v308_v46 }
  0x63   : > { %vm501_vm0 = vmpackc.low %vm310_vm14, %vm310_vm14 }
  0x64   : > { %502 = vmatprep.mubr.msk.bf16.mxu0 %vm501_vm0, %v729_v22 }
  0x65   : > { %504 = vmatmul.mubr.msk.bf16.vlgmr.msra.gmra.mxu0 %vm503_vm15, %v729_v22 }
 0x125   : > { %v367_v47 = vpop.f32.mrf.mxu0 }
 0x126   : > { %v512_v48 = vtrunc.f32 %v367_v47 }
 0x127   : > { %v369_v50 = vpop.f32.mrf.mxu0 }
 0x128   : > { %v513_v51 = vcvt.f32.s32 %v512_v48 }
 0x129   : > { %v370_v52 = vpop.f32.mrf.mxu0 }
 0x12a   : > { %v375_v53 = vadd.s32 %v513_v51, %v373_v49 }
 0x12b   : > { %v371_v54 = vpop.f32.mrf.mxu0 }
 0x12c   : > { %377 = vst.msk [vmem:[#allocation7] sm:$0xf] %vm376_vm1, %v375_v53 }
 0x12d   : > { %654 = shalt.err (!%p651_p13)
}
 0x12e   : > { %519 = dma.vmem_to_hbm [thread:$0]  (%p860_p7), %s388_s20, 64, %s895_s2, [#allocation4]  }
 0x12f   : > { %698 = dma.done.wait (%p860_p7), [#allocation4], 64  }
 0x130   : > { %700 = vsyncadd (%p860_p7), [#allocation4], 4294967232 }
 0x131 PF: > { %s19_s14 = sadd.s32 1, %s723_s14   ;;  %s901_s9 = smov %s707_s10 }
 0x132   : > { %p16_p0 = scmp.ge.s32.totalorder %s19_s14, 4   ;;  %s902_s10 = smov %s711_s11 }
 0x133   : > { %s903_s11 = smov %s797_s21  ;;  %s904_s12 = smov %s719_s13 }
 0x134   : > { %s905_s13 = smov %s907_s16  ;;  %18 = sbr.rel (!%p16_p0) target bundleno = 7 (0x7), region = 83 }
 0x139   :  { %400 = vsyncpa [#allocation3], 1 }
 0x13a   :  { %402 = vsyncpa [#allocation3 + $0x1], 1 }
 0x13b   :  { %403 = vsyncpa [#allocation6], 1 }
 0x13c   :  { %405 = vsyncpa [#allocation6 + $0x1], 1 }
 0x13d   :  { %406 = vsyncpa [#allocation4], 1 }
 0x13e   :  { %408 = vsyncpa [#allocation4 + $0x1], 1 }

</bundles_post_ra>
